<compile_context>
chip_gen: v6e
topology: v6e:2x2x1
jax: 0.10.0
libtpu: 0.0.40
codegen_flags: <defaults>
</compile_context>

<pallas_src>
import functools

import jax
import jax.numpy as jnp
from jax import lax
from jax.experimental import pallas as pl
from jax.experimental.pallas import tpu as pltpu


def _combined_loss_kernel(logits_ref, tpix_ref, vmask_ref, s_ref,
                          dice_ref, pt_ref, tpg_ref, *, C):
    """Per-tile body.  Ref shapes (after squeezing the batch block dim):
         logits_ref: (C, T)  f32/bf16     tpix_ref: (1, T) i32
         vmask_ref:  (C, T)  i8           s_ref:    (T, T//C) f32
         dice_ref:   (C, 3)  f32 (accumulated over the HW grid axis)
         pt_ref:     (1, T)  f32          tpg_ref:  (C, T//C) f32
    """
    k = pl.program_id(1)

    x = logits_ref[...].astype(jnp.float32)            # (C, T)
    t = tpix_ref[...]                                   # (1, T) int32
    T = x.shape[1]

    # ---- softmax / log-softmax over the channel (sublane) axis ----
    m = jnp.max(x, axis=0, keepdims=True)                # (1, T)
    xs = x - m
    ex = jnp.exp(xs)                                     # EUP
    denom = jnp.sum(ex, axis=0, keepdims=True)           # (1, T)
    probs = ex * pl.reciprocal(denom, approx=True)       # divide -> EUP slot
    log_probs = xs - jnp.log(denom)                      # exact log-softmax

    # ---- one-hot targets in pixel layout (shared by Dice and focal pt) ----
    # NOTE: out-of-range labels (e.g. ignore_index=255) give an all-zero one-hot
    # (pt=0, tp contribution 0) rather than erroring like torch.gather.
    cio = lax.broadcasted_iota(jnp.int32, (C, T), 0)
    onehot = (cio == t).astype(jnp.float32)              # (C, T)
    po = probs * onehot

    # ---- Dice partial sums, accumulated across the HW grid axis ----
    @pl.when(k == 0)
    def _init():
        dice_ref[...] = jnp.zeros_like(dice_ref)

    dice_ref[:, 0:1] += jnp.sum(po, axis=1, keepdims=True)       # intersection
    dice_ref[:, 1:2] += jnp.sum(probs, axis=1, keepdims=True)    # sum(probs)
    dice_ref[:, 2:3] += jnp.sum(onehot, axis=1, keepdims=True)   # sum(one-hot)

    # ---- focal: pt (correct gather) for the pixels of this tile ----
    pt_ref[...] = jnp.sum(po, axis=0, keepdims=True)             # (1, T)

    # ---- focal: -target_log_prob per pixel, reproducing the PyTorch
    #      `.view(-1, C)` gather.  vmask[c, hw] selects log_probs[c, hw] for the
    #      pixel p = c*(HW//C) + hw//C; the (T, T//C) 0/1 matrix S sums each
    #      group of C lanes, regrouping the masked values to per-pixel order. ----
    masked_nlp = vmask_ref[...].astype(jnp.float32) * (-log_probs)   # (C, T)
    tpg_ref[...] = jnp.dot(masked_nlp, s_ref[...],
                           preferred_element_type=jnp.float32)       # (C, T//C)


def _pick_tile_hw(HW, C):
    """Largest TILE <= ~max(512, 128*C) with (128*C) | TILE and TILE | HW.

    128*C | TILE keeps both the logits tile (lanes = TILE) and the grouped
    output tile (lanes = TILE // C) lane-aligned.  Falls back to a single tile
    over HW when no aligned divisor exists (fine for small inputs).
    """
    step = 128 * C
    cap = max(512, step)
    best = None
    t = step
    while t <= min(HW, cap):
        if HW % t == 0:
            best = t
        t += step
    # TODO(synk): ragged / unaligned HW tiling (e.g. C=21 with arbitrary H*W).
    return best if best is not None else HW


def combined_loss(logits_nchw, targets, *, dice_weight=0.5, focal_weight=0.5,
                  dice_smooth=1e-5, focal_gamma=2.0):
    """logits_nchw: (N, C, H, W) f32/bf16, targets: (N, H, W) int. Scalar f32."""
    N, C, H, W = logits_nchw.shape
    HW = H * W
    # TODO(synk): the PyTorch `.view(-1, C)` focal gather only decomposes into
    # rectangular tiles when C divides H*W; generalize if that case is needed.
    assert HW % C == 0, "kernel requires H*W divisible by num_classes"
    Q = HW // C
    T = _pick_tile_hw(HW, C)
    G = T // C
    K = HW // T

    # ---- layout / index plumbing (cheap wrapper-side XLA) ----
    logits3 = logits_nchw.reshape(N, C, HW)                  # keep caller dtype (bf16 ok)
    t_pix = targets.reshape(N, 1, HW).astype(jnp.int32)      # pixel-layout labels
    t_grp = targets.reshape(N, C, Q).astype(jnp.int32)       # t[n, c*Q + q]
    view_tgt = jnp.repeat(t_grp, C, axis=2)                  # (N, C, HW): t[n, c*Q + hw//C]
    rem = (jnp.arange(HW, dtype=jnp.int32) % C)[None, None, :]
    vmask = (view_tgt == rem).astype(jnp.int8)               # int8 selection mask
    # group-sum matrix: S[x, g] = 1  iff  x // C == g        (T, G)
    S = (jnp.arange(T, dtype=jnp.int32)[:, None] // C ==
         jnp.arange(G, dtype=jnp.int32)[None, :]).astype(jnp.float32)

    kernel = functools.partial(_combined_loss_kernel, C=C)

    itemsize = jnp.dtype(logits_nchw.dtype).itemsize
    cost = pl.CostEstimate(
        flops=int(12 * N * C * HW + 2 * N * HW * T),
        transcendentals=int(N * C * HW + 2 * N * HW),
        bytes_accessed=int(N * C * HW * (itemsize + 1) + N * HW * 4
                           + T * G * 4 + (N * C * 3 + 2 * N * HW) * 4),
    )

    dice_part, pt_out, tpg_out = pl.pallas_call(
        kernel,
        grid=(N, K),
        in_specs=[
            pl.BlockSpec((None, C, T), lambda n, k: (n, 0, k)),       # logits
            pl.BlockSpec((None, 1, T), lambda n, k: (n, 0, k)),       # targets (pixel)
            pl.BlockSpec((None, C, T), lambda n, k: (n, 0, k)),       # view mask (int8)
            pl.BlockSpec((T, G), lambda n, k: (0, 0)),                # group-sum matrix
        ],
        out_specs=[
            pl.BlockSpec((None, C, 3), lambda n, k: (n, 0, 0)),       # dice partials (acc)
            pl.BlockSpec((None, 1, T), lambda n, k: (n, 0, k)),       # pt per pixel
            pl.BlockSpec((None, C, G), lambda n, k: (n, 0, k)),       # -target_logprob
        ],
        out_shape=[
            jax.ShapeDtypeStruct((N, C, 3), jnp.float32),
            jax.ShapeDtypeStruct((N, 1, HW), jnp.float32),
            jax.ShapeDtypeStruct((N, C, Q), jnp.float32),
        ],
        compiler_params=pltpu.CompilerParams(
            dimension_semantics=("parallel", "arbitrary")),
        cost_estimate=cost,
    )(logits3, t_pix, vmask, S)

    # ---- tiny finalize in the wrapper ----
    inter = dice_part[:, :, 0]
    union = dice_part[:, :, 1] + dice_part[:, :, 2]
    dice = (2.0 * inter + dice_smooth) / (union + dice_smooth)       # (N, C)
    dice_loss = 1.0 - jnp.mean(dice)

    pt = pt_out.reshape(N, HW)
    neg_tp = tpg_out.reshape(N, HW)      # row-major (c, q) -> pixel p = c*Q + q
    om = 1.0 - pt
    w = om * om if float(focal_gamma) == 2.0 else jnp.power(om, focal_gamma)
    focal_loss = jnp.mean(w * neg_tp)

    return dice_weight * dice_loss + focal_weight * focal_loss


def _reference(logits_nchw, targets, dice_weight=0.5, focal_weight=0.5,
               smooth=1e-5, gamma=2.0):
    """Plain-JAX replication of the PyTorch forward (including the .view flatten)."""
    N, C, H, W = logits_nchw.shape
    probs = jax.nn.softmax(logits_nchw, axis=1)
    onehot = jax.nn.one_hot(targets, C, dtype=jnp.float32).transpose(0, 3, 1, 2)
    inter = jnp.sum(probs * onehot, axis=(2, 3))
    union = jnp.sum(probs, axis=(2, 3)) + jnp.sum(onehot, axis=(2, 3))
    dice = (2.0 * inter + smooth) / (union + smooth)
    dice_loss = 1.0 - jnp.mean(jnp.mean(dice, axis=0))

    log_probs = jax.nn.log_softmax(logits_nchw, axis=1)
    lp_flat = log_probs.reshape(-1, C)                 # == torch .view(-1, C) on NCHW
    t_flat = targets.reshape(-1)
    tp = jnp.take_along_axis(lp_flat, t_flat[:, None], axis=1)[:, 0]
    pt = jnp.take_along_axis(probs, targets[:, None, :, :].astype(jnp.int32),
                             axis=1)[:, 0].reshape(-1)
    focal = jnp.mean(-((1.0 - pt) ** gamma) * tp)
    return dice_weight * dice_loss + focal_weight * focal


if __name__ == "__main__":
    key = jax.random.PRNGKey(0)
    k1, k2 = jax.random.split(key)
    N, C, H, W = 2, 4, 16, 16
    logits = jax.random.normal(k1, (N, C, H, W), dtype=jnp.float32)
    targets = jax.random.randint(k2, (N, H, W), 0, C, dtype=jnp.int32)

    loss_fn = jax.jit(combined_loss)

    out = jax.block_until_ready(loss_fn(logits, targets))
    ref = _reference(logits, targets)
    # tolerance covers the EUP approx-reciprocal softmax and MXU selection matmul
    if not jnp.allclose(out, ref, rtol=5e-3, atol=5e-3):
        raise AssertionError(f"mismatch: pallas={float(out)} ref={float(ref)}")

    # bf16 logits path (kernel upcasts to f32 internally)
    out_bf16 = jax.block_until_ready(loss_fn(logits.astype(jnp.bfloat16), targets))
    if not jnp.allclose(out_bf16, ref, rtol=5e-2, atol=5e-2):
        raise AssertionError(f"bf16 mismatch: pallas={float(out_bf16)} ref={float(ref)}")

    print("KERNEL_OK")
</pallas_src>

<mosaic_0001>
module attributes {stable_mosaic.version = 11 : i64} {
  func.func @_combined_loss_kernel(%arg0: i32, %arg1: i32, %arg2: memref<1x4x256xf32, #tpu.memory_space<vmem>>, %arg3: memref<1x1x256xi32, #tpu.memory_space<vmem>>, %arg4: memref<1x4x256xi8, #tpu.memory_space<vmem>>, %arg5: memref<256x64xf32, #tpu.memory_space<vmem>>, %arg6: memref<1x4x3xf32, #tpu.memory_space<vmem>>, %arg7: memref<1x1x256xf32, #tpu.memory_space<vmem>>, %arg8: memref<1x4x64xf32, #tpu.memory_space<vmem>>) attributes {dimension_semantics = [#tpu.dimension_semantics<parallel>, #tpu.dimension_semantics<arbitrary>], iteration_bounds = array<i64: 2, 1>, scalar_prefetch = 0 : i64, scratch_operands = 0 : i64, tpu.core_type = #tpu.core_type<tc>, window_params = [{transform_indices = @transform_0, window_bounds = array<i64: 1, 4, 256>}, {transform_indices = @transform_1, window_bounds = array<i64: 1, 1, 256>}, {transform_indices = @transform_2, window_bounds = array<i64: 1, 4, 256>}, {pipeline_mode = #tpu.pipeline_mode<synchronous>, transform_indices = @transform_3, window_bounds = array<i64: 256, 64>}, {transform_indices = @transform_4, window_bounds = array<i64: 1, 4, 3>}, {transform_indices = @transform_5, window_bounds = array<i64: 1, 1, 256>}, {transform_indices = @transform_6, window_bounds = array<i64: 1, 4, 64>}]} {
    %c0 = arith.constant 0 : index
    %c0_0 = arith.constant 0 : index
    %c0_1 = arith.constant 0 : index
    %0 = vector.load %arg2[%c0, %c0_0, %c0_1] : memref<1x4x256xf32, #tpu.memory_space<vmem>>, vector<1x4x256xf32>
    %1 = vector.shape_cast %0 : vector<1x4x256xf32> to vector<4x256xf32>
    %c0_2 = arith.constant 0 : index
    %c0_3 = arith.constant 0 : index
    %c0_4 = arith.constant 0 : index
    %2 = vector.load %arg3[%c0_2, %c0_3, %c0_4] : memref<1x1x256xi32, #tpu.memory_space<vmem>>, vector<1x1x256xi32>
    %3 = vector.shape_cast %2 : vector<1x1x256xi32> to vector<1x256xi32>
    %cst = arith.constant dense<0xFF800000> : vector<256xf32>
    %4 = vector.multi_reduction <maximumf>, %1, %cst [0] : vector<4x256xf32> to vector<256xf32>
    %5 = vector.shape_cast %4 : vector<256xf32> to vector<1x256xf32>
    %6 = vector.broadcast %5 : vector<1x256xf32> to vector<4x256xf32>
    %7 = arith.subf %1, %6 : vector<4x256xf32>
    %8 = math.exp %7 : vector<4x256xf32>
    %cst_5 = arith.constant dense<0.000000e+00> : vector<256xf32>
    %9 = vector.multi_reduction <add>, %8, %cst_5 [0] : vector<4x256xf32> to vector<256xf32>
    %10 = vector.shape_cast %9 : vector<256xf32> to vector<1x256xf32>
    %11 = tpu.reciprocal %10 {approx = true} : vector<1x256xf32> -> vector<1x256xf32>
    %12 = vector.broadcast %11 : vector<1x256xf32> to vector<4x256xf32>
    %13 = arith.mulf %8, %12 : vector<4x256xf32>
    %14 = math.log %10 : vector<1x256xf32>
    %15 = vector.broadcast %14 : vector<1x256xf32> to vector<4x256xf32>
    %16 = arith.subf %7, %15 : vector<4x256xf32>
    %17 = tpu.iota {dimensions = array<i32: 0>} : vector<4x256xi32>
    %18 = vector.broadcast %3 : vector<1x256xi32> to vector<4x256xi32>
    %19 = arith.cmpi eq, %17, %18 : vector<4x256xi32>
    %20 = arith.extui %19 : vector<4x256xi1> to vector<4x256xi32>
    %21 = arith.sitofp %20 : vector<4x256xi32> to vector<4x256xf32>
    %22 = arith.mulf %13, %21 : vector<4x256xf32>
    %c0_i32 = arith.constant 0 : i32
    %23 = arith.cmpi eq, %arg1, %c0_i32 : i32
    %24 = arith.extui %23 : i1 to i32
    %c0_i32_6 = arith.constant 0 : i32
    %25 = arith.cmpi ne, %24, %c0_i32_6 : i32
    scf.if %25 {
      %cst_40 = arith.constant 0.000000e+00 : f32
      %66 = vector.broadcast %cst_40 : f32 to vector<4x3xf32>
      %c0_41 = arith.constant 0 : index
      %c0_42 = arith.constant 0 : index
      %c0_43 = arith.constant 0 : index
      %67 = vector.load %arg6[%c0_41, %c0_42, %c0_43] : memref<1x4x3xf32, #tpu.memory_space<vmem>>, vector<1x4x3xf32>
      %68 = vector.shape_cast %67 : vector<1x4x3xf32> to vector<4x3xf32>
      %69 = vector.shape_cast %66 : vector<4x3xf32> to vector<1x4x3xf32>
      tpu.vector_store %arg6[%c0_41, %c0_42, %c0_43], %69 {strides = array<i32>} : memref<1x4x3xf32, #tpu.memory_space<vmem>>, vector<1x4x3xf32>,
    } else {
    }
    %c0_7 = arith.constant 0 : index
    %c0_8 = arith.constant 0 : index
    %c0_9 = arith.constant 0 : index
    %26 = vector.load %arg6[%c0_7, %c0_8, %c0_9] : memref<1x4x3xf32, #tpu.memory_space<vmem>>, vector<1x4x1xf32>
    %27 = vector.shape_cast %26 : vector<1x4x1xf32> to vector<4x1xf32>
    %cst_10 = arith.constant dense<0.000000e+00> : vector<4xf32>
    %28 = vector.multi_reduction <add>, %22, %cst_10 [1] : vector<4x256xf32> to vector<4xf32>
    %29 = vector.shape_cast %28 : vector<4xf32> to vector<4x1xf32>
    %30 = arith.addf %27, %29 : vector<4x1xf32>
    %c0_11 = arith.constant 0 : index
    %c0_12 = arith.constant 0 : index
    %c0_13 = arith.constant 0 : index
    %31 = vector.load %arg6[%c0_11, %c0_12, %c0_13] : memref<1x4x3xf32, #tpu.memory_space<vmem>>, vector<1x4x1xf32>
    %32 = vector.shape_cast %31 : vector<1x4x1xf32> to vector<4x1xf32>
    %33 = vector.shape_cast %30 : vector<4x1xf32> to vector<1x4x1xf32>
    tpu.vector_store %arg6[%c0_11, %c0_12, %c0_13], %33 {strides = array<i32>} : memref<1x4x3xf32, #tpu.memory_space<vmem>>, vector<1x4x1xf32>,
    %c0_14 = arith.constant 0 : index
    %c0_15 = arith.constant 0 : index
    %c1 = arith.constant 1 : index
    %34 = vector.load %arg6[%c0_14, %c0_15, %c1] : memref<1x4x3xf32, #tpu.memory_space<vmem>>, vector<1x4x1xf32>
    %35 = vector.shape_cast %34 : vector<1x4x1xf32> to vector<4x1xf32>
    %cst_16 = arith.constant dense<0.000000e+00> : vector<4xf32>
    %36 = vector.multi_reduction <add>, %13, %cst_16 [1] : vector<4x256xf32> to vector<4xf32>
    %37 = vector.shape_cast %36 : vector<4xf32> to vector<4x1xf32>
    %38 = arith.addf %35, %37 : vector<4x1xf32>
    %c0_17 = arith.constant 0 : index
    %c0_18 = arith.constant 0 : index
    %c1_19 = arith.constant 1 : index
    %39 = vector.load %arg6[%c0_17, %c0_18, %c1_19] : memref<1x4x3xf32, #tpu.memory_space<vmem>>, vector<1x4x1xf32>
    %40 = vector.shape_cast %39 : vector<1x4x1xf32> to vector<4x1xf32>
    %41 = vector.shape_cast %38 : vector<4x1xf32> to vector<1x4x1xf32>
    tpu.vector_store %arg6[%c0_17, %c0_18, %c1_19], %41 {strides = array<i32>} : memref<1x4x3xf32, #tpu.memory_space<vmem>>, vector<1x4x1xf32>,
    %c0_20 = arith.constant 0 : index
    %c0_21 = arith.constant 0 : index
    %c2 = arith.constant 2 : index
    %42 = vector.load %arg6[%c0_20, %c0_21, %c2] : memref<1x4x3xf32, #tpu.memory_space<vmem>>, vector<1x4x1xf32>
    %43 = vector.shape_cast %42 : vector<1x4x1xf32> to vector<4x1xf32>
    %cst_22 = arith.constant dense<0.000000e+00> : vector<4xf32>
    %44 = vector.multi_reduction <add>, %21, %cst_22 [1] : vector<4x256xf32> to vector<4xf32>
    %45 = vector.shape_cast %44 : vector<4xf32> to vector<4x1xf32>
    %46 = arith.addf %43, %45 : vector<4x1xf32>
    %c0_23 = arith.constant 0 : index
    %c0_24 = arith.constant 0 : index
    %c2_25 = arith.constant 2 : index
    %47 = vector.load %arg6[%c0_23, %c0_24, %c2_25] : memref<1x4x3xf32, #tpu.memory_space<vmem>>, vector<1x4x1xf32>
    %48 = vector.shape_cast %47 : vector<1x4x1xf32> to vector<4x1xf32>
    %49 = vector.shape_cast %46 : vector<4x1xf32> to vector<1x4x1xf32>
    tpu.vector_store %arg6[%c0_23, %c0_24, %c2_25], %49 {strides = array<i32>} : memref<1x4x3xf32, #tpu.memory_space<vmem>>, vector<1x4x1xf32>,
    %cst_26 = arith.constant dense<0.000000e+00> : vector<256xf32>
    %50 = vector.multi_reduction <add>, %22, %cst_26 [0] : vector<4x256xf32> to vector<256xf32>
    %51 = vector.shape_cast %50 : vector<256xf32> to vector<1x256xf32>
    %c0_27 = arith.constant 0 : index
    %c0_28 = arith.constant 0 : index
    %c0_29 = arith.constant 0 : index
    %52 = vector.load %arg7[%c0_27, %c0_28, %c0_29] : memref<1x1x256xf32, #tpu.memory_space<vmem>>, vector<1x1x256xf32>
    %53 = vector.shape_cast %52 : vector<1x1x256xf32> to vector<1x256xf32>
    %54 = vector.shape_cast %51 : vector<1x256xf32> to vector<1x1x256xf32>
    tpu.vector_store %arg7[%c0_27, %c0_28, %c0_29], %54 {strides = array<i32>} : memref<1x1x256xf32, #tpu.memory_space<vmem>>, vector<1x1x256xf32>,
    %c0_30 = arith.constant 0 : index
    %c0_31 = arith.constant 0 : index
    %c0_32 = arith.constant 0 : index
    %55 = vector.load %arg4[%c0_30, %c0_31, %c0_32] : memref<1x4x256xi8, #tpu.memory_space<vmem>>, vector<1x4x256xi8>
    %56 = vector.shape_cast %55 : vector<1x4x256xi8> to vector<4x256xi8>
    %57 = arith.sitofp %56 : vector<4x256xi8> to vector<4x256xf32>
    %cst_33 = arith.constant 0.000000e+00 : f32
    %58 = vector.broadcast %cst_33 : f32 to vector<4x256xf32>
    %59 = arith.subf %58, %16 : vector<4x256xf32>
    %60 = arith.mulf %57, %59 : vector<4x256xf32>
    %c0_34 = arith.constant 0 : index
    %c0_35 = arith.constant 0 : index
    %61 = vector.load %arg5[%c0_34, %c0_35] : memref<256x64xf32, #tpu.memory_space<vmem>>, vector<256x64xf32>
    %cst_36 = arith.constant dense<0.000000e+00> : vector<4x64xf32>
    %62 = tpu.matmul %60, %61, %cst_36 {dimension_numbers = #tpu.dot_dimension_numbers<[1], [0], [0], [1], [0, 0, 1, 1], [], []>} : vector<4x256xf32>, vector<256x64xf32>, vector<4x64xf32> -> vector<4x64xf32>
    %c0_37 = arith.constant 0 : index
    %c0_38 = arith.constant 0 : index
    %c0_39 = arith.constant 0 : index
    %63 = vector.load %arg8[%c0_37, %c0_38, %c0_39] : memref<1x4x64xf32, #tpu.memory_space<vmem>>, vector<1x4x64xf32>
    %64 = vector.shape_cast %63 : vector<1x4x64xf32> to vector<4x64xf32>
    %65 = vector.shape_cast %62 : vector<4x64xf32> to vector<1x4x64xf32>
    tpu.vector_store %arg8[%c0_37, %c0_38, %c0_39], %65 {strides = array<i32>} : memref<1x4x64xf32, #tpu.memory_space<vmem>>, vector<1x4x64xf32>,
    return
  }
  func.func @transform_0(%arg0: i32, %arg1: i32) -> (i32, i32, i32) {
    %c0_i32 = arith.constant 0 : i32
    %c0_i32_0 = arith.constant 0 : i32
    return %arg0, %c0_i32, %arg1 : i32, i32, i32
  }
  func.func @transform_1(%arg0: i32, %arg1: i32) -> (i32, i32, i32) {
    %c0_i32 = arith.constant 0 : i32
    %c0_i32_0 = arith.constant 0 : i32
    return %arg0, %c0_i32, %arg1 : i32, i32, i32
  }
  func.func @transform_2(%arg0: i32, %arg1: i32) -> (i32, i32, i32) {
    %c0_i32 = arith.constant 0 : i32
    %c0_i32_0 = arith.constant 0 : i32
    return %arg0, %c0_i32, %arg1 : i32, i32, i32
  }
  func.func @transform_3(%arg0: i32, %arg1: i32) -> (i32, i32) {
    %c0_i32 = arith.constant 0 : i32
    %c0_i32_0 = arith.constant 0 : i32
    %c0_i32_1 = arith.constant 0 : i32
    return %c0_i32, %c0_i32_0 : i32, i32
  }
  func.func @transform_4(%arg0: i32, %arg1: i32) -> (i32, i32, i32) {
    %c0_i32 = arith.constant 0 : i32
    %c0_i32_0 = arith.constant 0 : i32
    %c0_i32_1 = arith.constant 0 : i32
    return %arg0, %c0_i32, %c0_i32_0 : i32, i32, i32
  }
  func.func @transform_5(%arg0: i32, %arg1: i32) -> (i32, i32, i32) {
    %c0_i32 = arith.constant 0 : i32
    %c0_i32_0 = arith.constant 0 : i32
    return %arg0, %c0_i32, %arg1 : i32, i32, i32
  }
  func.func @transform_6(%arg0: i32, %arg1: i32) -> (i32, i32, i32) {
    %c0_i32 = arith.constant 0 : i32
    %c0_i32_0 = arith.constant 0 : i32
    return %arg0, %c0_i32, %arg1 : i32, i32, i32
  }
}

</mosaic_0001>

<bundles_post_ra>
// kernel: combined_loss.1
= control target key start
LH: loop header
LB: loop body
LE: loop exit
PB: predicated region body
PF: predicated region fallthrough
CT: control target
= control target key end

     0   :  { %s984_s21 = smov 0   ;;  %s986_s22 = smov 0   ;;  %s1182_s0 = inlined_call_operand.vmem [shape: f32[2,4,256], index: 0, kind: input, shape index: {}]   ;;  %s1183_s1 = inlined_call_operand.vmem [shape: s32[2,1,256], index: 1, kind: input, shape index: {}]   ;;  %s1184_s2 = inlined_call_operand.vmem [shape: s8[2,4,256], index: 2, kind: input, shape index: {}]   ;;  %s1185_s3 = inlined_call_operand.vmem [shape: f32[256,64], index: 3, kind: input, shape index: {}]   ;;  %s1186_s4 = inlined_call_operand.vmem [shape: f32[2,4,3], index: 4, kind: output, shape index: {0}]   ;;  %s1187_s5 = inlined_call_operand.vmem [shape: f32[2,1,256], index: 5, kind: output, shape index: {1}]   ;;  %s1188_s6 = inlined_call_operand.vmem [shape: f32[2,4,64], index: 6, kind: output, shape index: {2}]  }
   0x1   :  { %s988_s23 = smov 0  }
   0x2 LB: > { %s29_s24 = sadd.s32 1, %s941_s22  ;;  %p838_p0 = scmp.ge.s32.totalorder %s945_s23, 1  ;;  %s945_s23 = sphi %s988_s23, %s17_s23   ;;  %s941_s22 = sphi %s986_s22, %s1190_s22   ;;  %s937_s21 = sphi %s984_s21, %s1189_s21  }
   0x3   : > { %p31_p1 = scmp.ge.s32.totalorder %s29_s24, 2  ;;  %p272_p2 = scmp.lt.s32.totalorder %s945_s23, 3 }
   0x5   : > { %s1192_s24 = smov (%p31_p1, %s29_s24), 0  ;;  %p273_p3 = pnand %p838_p0, %p272_p2 }
   0x6   : > { %p337_p4 = scmp.lt.s32.totalorder (!%p273_p3), %s937_s21, 1 }
   0x7   : > { %276 = sbr.rel (%p273_p3) target bundleno = 293 (0x125), region = 36 }
   0xc   : > { %v575_v0 = vld [vmem:[%s1185_s3 + $0xf8] sm:$0xff]  ;;  %v574_v2 = vld [vmem:[%s1185_s3 + $0xf0] sm:$0xff]  ;;  %v444_v3 = vlaneseq  ;;  %v573_v5 = vld [vmem:[%s1185_s3 + $0xe8] sm:$0xff]  ;;  %s1194_s21 = smov (!%p337_p4, %s937_s21), 1  ;;  %vm469_vm0 = vcmask 19456   ;;  %vm389_vm1 = vcmask 1043456  }
   0xd   : > { %v559_v1 = vld [vmem:[%s1185_s3 + $0x78] sm:$0xff]  ;;  %851 = vmatprep.subr.mxu0 %v575_v0  ;;  %v558_v4 = vld [vmem:[%s1185_s3 + $0x70] sm:$0xff]  ;;  %v557_v6 = vld [vmem:[%s1185_s3 + $0x68] sm:$0xff]  ;;  %s850_s15 = sshll.u32 %s1194_s21, 3  ;;  %s1036_s20 = sshll.u32 %s1194_s21, 1  ;;  %v947_v15 = vmov 0.0  }
   0xe   : > { %852 = vmatpush3.msra.mxu0 %v559_v1  ;;  %v572_v7 = vld [vmem:[%s1185_s3 + $0xe0] sm:$0xff]  ;;  %v1027_v8 = vshrl.u32 %v444_v3, 7  ;;  %v571_v10 = vld [vmem:[%s1185_s3 + $0xd8] sm:$0xff]  ;;  %s843_s25 = sshll.u32 %s1194_s21, 2  ;;  %s344_s30 = scalar_lea.vmem %s1182_s0, %s850_s15  ;;  %v570_v12 = vld [vmem:[%s1185_s3 + $0xd0] sm:$0xff]  ;;  %vm536_vm4 = vcmp.lt.s32.totalorder %v444_v3, 256 }
   0xf   : > { %853 = vmatprep.subr.mxu0 %v574_v2  ;;  %v556_v9 = vld [vmem:[%s1185_s3 + $0x60] sm:$0xff]  ;;  %v555_v11 = vld [vmem:[%s1185_s3 + $0x58] sm:$0xff]  ;;  %s1050_s9 = scalar_lea.vmem %s1186_s4, %s843_s25  ;;  %s353_s14 = scalar_lea.vmem %s1183_s1, %s1036_s20  ;;  %v554_v16 = vld [vmem:[%s1185_s3 + $0x50] sm:$0xff]  ;;  %vm481_vm5 = vcmask 3072   ;;  %vm493_vm6 = vcmask 11272   ;;  %vm502_vm7 = vcmask 19472  }
  0x10   : > { %854 = vmatpush3.msra.mxu0 %v558_v4  ;;  %v448_v13 = vsub.s32 0, %v1027_v8  ;;  %v452_v14 = vsub.s32 1, %v1027_v8  ;;  %470 = vst.msk [vmem:[%s1050_s9] sm:$0xf] %vm469_vm0, %v947_v15  ;;  %v569_v17 = vld [vmem:[%s1185_s3 + $0xc8] sm:$0xff]  ;;  %v1069_v18 = vld [vmem:[%s344_s30] sm:$0xff]  ;;  %s362_s7 = scalar_lea.vmem %s1184_s2, %s1036_s20  ;;  %s375_s11 = scalar_lea.vmem %s1187_s5, %s1036_s20 }
  0x11   : > { %855 = vmatprep.subr.mxu0 %v573_v5  ;;  %v553_v19 = vld [vmem:[%s1185_s3 + $0x48] sm:$0xff]  ;;  %v385_v20 = vld [vmem:[%s353_s14] sm:$0x3]  ;;  %v387_v21 = vcombine.high %v1069_v18, %v1069_v18  ;;  %v390_v22 = vsel %vm389_vm1, %v1069_v18, -inf  ;;  %v567_v29 = vld [vmem:[%s1185_s3 + $0xb8] sm:$0xff]  ;;  %s383_s13 = scalar_lea.vmem %s1188_s6, %s843_s25  ;;  %vm649_vm8 = vcmask 519168  }
  0x12   : > { %856 = vmatpush3.msra.mxu0 %v557_v6  ;;  %v568_v23 = vld [vmem:[%s1185_s3 + $0xc0] sm:$0xff]  ;;  %v391_v24 = vrot.slane %v390_v22, 4  ;;  %v449_v25 = vrot.slane %v385_v20, %v448_v13  ;;  %v453_v26 = vrot.slane %v385_v20, %v452_v14  ;;  %v551_v32 = vld [vmem:[%s1185_s3 + $0x38] sm:$0xff]  ;;  %v566_v34 = vld [vmem:[%s1185_s3 + $0xb0] sm:$0xff] }
  0x13   : > { %857 = vmatprep.subr.mxu0 %v572_v7  ;;  %v552_v27 = vld [vmem:[%s1185_s3 + $0x40] sm:$0xff]  ;;  %v397_v28 = vsel %vm389_vm1, %v387_v21, -inf  ;;  %v550_v39 = vld [vmem:[%s1185_s3 + $0x30] sm:$0xff]  ;;  %v565_v41 = vld [vmem:[%s1185_s3 + $0xa8] sm:$0xff] }
  0x14   : > { %858 = vmatpush3.msra.mxu0 %v556_v9  ;;  %v392_v30 = vmax.f32 %v390_v22, %v391_v24  ;;  %v398_v31 = vrot.slane %v397_v28, 4  ;;  %vm454_vm2 = vcmp.eq.s32.totalorder %v1027_v8, %v449_v25  ;;  %vm455_vm3 = vcmp.eq.s32.totalorder %v1027_v8, %v453_v26  ;;  %v549_v45 = vld [vmem:[%s1185_s3 + $0x28] sm:$0xff]  ;;  %v564_v46 = vld [vmem:[%s1185_s3 + $0xa0] sm:$0xff]  ;;  %v563_v50 = vld [vmem:[%s1185_s3 + $0x98] sm:$0xff] }
  0x15   : > { %859 = vmatprep.subr.mxu0 %v571_v10  ;;  %v1093_v33 = vsel %vm454_vm2, 1.0, %v947_v15  ;;  %v1098_v37 = vsel %vm455_vm3, 1.0, %v947_v15  ;;  %v548_v49 = vld [vmem:[%s1185_s3 + $0x20] sm:$0xff]  ;;  %v547_v53 = vld [vmem:[%s1185_s3 + $0x18] sm:$0xff]  ;;  %v562_v54 = vld [vmem:[%s1185_s3 + $0x90] sm:$0xff] }
  0x16   : > { %860 = vmatpush3.msra.mxu0 %v555_v11  ;;  %v393_v35 = vrot.slane %v392_v30, 2  ;;  %v399_v36 = vmax.f32 %v397_v28, %v398_v31  ;;  %v496_v38 = vsel %vm389_vm1, %v1093_v33, 0.0  ;;  %v497_v40 = vsel %vm389_vm1, %v1098_v37, 0.0  ;;  %v546_v56 = vld [vmem:[%s1185_s3 + $0x10] sm:$0xff]  ;;  %v561_v57 = vld [vmem:[%s1185_s3 + $0x88] sm:$0xff]  ;;  %v560_v60 = vld [vmem:[%s1185_s3 + $0x80] sm:$0xff] }
  0x17   : > { %861 = vmatprep.subr.mxu0 %v570_v12  ;;  %v498_v44 = vadd.f32 %v497_v40, %v496_v38  ;;  %v545_v59 = vld [vmem:[%s1185_s3 + $0x8] sm:$0xff]  ;;  %v544_v62 = vld [vmem:[%s1185_s3] sm:$0xff]  ;;  %v462_v25 = vcombine.low %v1093_v33, %v1098_v37 }
  0x18   : > { %862 = vmatpush3.msra.mxu0 %v554_v16  ;;  %v394_v42 = vmax.f32 %v392_v30, %v393_v35  ;;  %v400_v43 = vrot.slane %v399_v36, 2  ;;  %v539_v20 = vld [vmem:[%s362_s7] sm:$0x3] }
  0x19   : > { %863 = vmatprep.subr.mxu0 %v569_v17  ;;  %499 = vadd.xlane.f32.xlu1 %v498_v44 }
  0x1a   : > { %864 = vmatpush3.msra.mxu0 %v553_v19  ;;  %v395_v47 = vrot.slane %v394_v42, 1  ;;  %v401_v48 = vmax.f32 %v399_v36, %v400_v43 }
  0x1b   : > { %865 = vmatprep.subr.mxu0 %v568_v23 }
  0x1c   : > { %866 = vmatpush3.msra.mxu0 %v552_v27  ;;  %v396_v51 = vmax.f32 %v394_v42, %v395_v47  ;;  %v402_v52 = vrot.slane %v401_v48, 1  ;;  %v540_v27 = vunpack.c.0.s8 %v539_v20 }
  0x1d   : > { %867 = vmatprep.subr.mxu0 %v567_v29 }
  0x1e   : > { %868 = vmatpush3.msra.mxu0 %v551_v32  ;;  %v403_v55 = vmax.f32 %v401_v48, %v402_v52 }
  0x1f   : > { %869 = vmatprep.subr.mxu0 %v566_v34  ;;  %v541_v34 = vcvt.s32.f32 %v540_v27 }
  0x20   : > { %870 = vmatpush3.msra.mxu0 %v550_v39  ;;  %v406_v58 = vcombine.low %v396_v51, %v403_v55 }
  0x21   : > { %871 = vmatprep.subr.mxu0 %v565_v41 }
  0x22   : > { %872 = vmatpush3.msra.mxu0 %v549_v45  ;;  %v408_v61 = vsub.f32 %v1069_v18, %v406_v58  ;;  %v948_v45 = vmov 1966171168  }
  0x23   : > { %873 = vmatprep.subr.mxu0 %v564_v46  ;;  %v520_v46 = vunpack.c.l.s4 %v948_v45 }
  0x24   : > { %874 = vmatpush3.msra.mxu0 %v548_v49  ;;  %v409_v63 = vmul.f32 1.442695, %v408_v61 }
  0x25   : > { %875 = vmatprep.subr.mxu0 %v563_v50  ;;  %v521_v55 = vunpack.c.0.s8 %v520_v46 }
  0x26   : > { %876 = vmatpush3.msra.mxu0 %v547_v53  ;;  %913 = vpow2.f32 %v409_v63  ;;  %v471_v63 = vld [vmem:[%s1050_s9] sm:$0xf] }
  0x27   : > { %877 = vmatprep.subr.mxu0 %v562_v54 }
  0x28   : > { %878 = vmatpush3.msra.mxu0 %v546_v56 }
  0x29   : > { %879 = vmatprep.subr.mxu0 %v561_v57 }
  0x2a   : > { %880 = vmatpush3.msra.mxu0 %v545_v59  ;;  %v524_v59 = vsub.s32 %v521_v55, %v1027_v8 }
  0x2b   : > { %881 = vmatprep.subr.mxu0 %v560_v60 }
  0x2c   : > { %882 = vmatpush3.msra.mxu0 %v544_v62 }
  0x33   : > { %v914_v0 = vpop.eup %913 }
  0x34   : > { %v412_v1 = vcombine.high %v914_v0, %v914_v0  ;;  %v414_v2 = vsel %vm389_vm1, %v914_v0, 0.0 }
  0x35   : > { %v415_v4 = vrot.slane %v414_v2, 4 }
  0x36   : > { %v421_v5 = vsel %vm389_vm1, %v412_v1, 0.0 }
  0x37   : > { %v416_v6 = vadd.f32 %v415_v4, %v414_v2  ;;  %v422_v7 = vrot.slane %v421_v5, 4 }
  0x39   : > { %v417_v9 = vrot.slane %v416_v6, 2  ;;  %v423_v10 = vadd.f32 %v422_v7, %v421_v5 }
  0x3b   : > { %v418_v11 = vadd.f32 %v417_v9, %v416_v6  ;;  %v424_v12 = vrot.slane %v423_v10, 2 }
  0x3d   : > { %v419_v13 = vrot.slane %v418_v11, 1  ;;  %v425_v14 = vadd.f32 %v424_v12, %v423_v10 }
  0x3f   : > { %v420_v15 = vadd.f32 %v419_v13, %v418_v11  ;;  %v426_v16 = vrot.slane %v425_v14, 1 }
  0x41   : > { %v427_v17 = vadd.f32 %v426_v16, %v425_v14  ;;  %915 = vrcp.f32 %v420_v15 }
  0x42   : > { %917 = vlog2.f32 %v420_v15 }
  0x43   : > { %919 = vrcp.f32 %v427_v17 }
  0x44   : > { %921 = vlog2.f32 %v427_v17 }
  0x4e   : > { %v916_v18 = vpop.eup %915 }
  0x4f   : > { %v918_v19 = vpop.eup %917 }
  0x50   : > { %v920_v21 = vpop.eup %919  ;;  %v436_v22 = vmul.f32 0.6931472, %v918_v19 }
  0x51   : > { %v922_v23 = vpop.eup %921  ;;  %v432_v24 = vcombine.low %v916_v18, %v920_v21 }
  0x52   : > { %v438_v26 = vmul.f32 0.6931472, %v922_v23 }
  0x53   : > { %v434_v28 = vmul.f32 %v914_v0, %v432_v24 }
  0x54   : > { %v441_v29 = vcombine.low %v436_v22, %v438_v26 }
  0x55   : > { %v464_v30 = vmul.f32 %v462_v25, %v434_v28  ;;  %v485_v31 = vcombine.high %v434_v28, %v434_v28  ;;  %v487_v41 = vsel %vm389_vm1, %v434_v28, 0.0 }
  0x56   : > { %v443_v32 = vsub.f32 %v408_v61, %v441_v29 }
  0x57   : > { %v473_v35 = vcombine.high %v464_v30, %v464_v30  ;;  %v475_v36 = vsel %vm389_vm1, %v464_v30, 0.0  ;;  %v488_v42 = vsel %vm389_vm1, %v485_v31, 0.0 }
  0x58   : > { %v542_v38 = vsub.f32 0.0, %v443_v32  ;;  %v504_v39 = vrot.slane %v475_v36, 4  ;;  %v489_v50 = vadd.f32 %v488_v42, %v487_v41 }
  0x59   : > { %v476_v40 = vsel %vm389_vm1, %v473_v35, 0.0 }
  0x5a   : > { %v543_v33 = vmul.f32 %v542_v38, %v541_v34  ;;  %v477_v37 = vadd.f32 %v476_v40, %v475_v36  ;;  %v505_v43 = vadd.f32 %v504_v39, %v475_v36  ;;  %v510_v44 = vrot.slane %v476_v40, 4 }
  0x5c   : > { %v577_v47 = vcombine.high %v543_v33, %v543_v33  ;;  %v506_v48 = vrot.slane %v505_v43, 2  ;;  %v511_v49 = vadd.f32 %v510_v44, %v476_v40  ;;  %478 = vadd.xlane.f32.xlu0 %v477_v37 }
  0x5e   : > { %643 = vmatprep.mubr.f32.mxu0 %v577_v47  ;;  %v507_v51 = vadd.f32 %v506_v48, %v505_v43  ;;  %v512_v52 = vrot.slane %v511_v49, 2 }
  0x5f   : > { %644 = vmatmul.mubr.f32.vlgmr.msra.gmra.mxu0 %v543_v33 }
  0x60   : > { %v508_v53 = vrot.slane %v507_v51, 1  ;;  %v513_v54 = vadd.f32 %v512_v52, %v511_v49  ;;  %490 = vadd.xlane.f32.xlu0 %v489_v50 }
  0x62   : > { %v509_v56 = vadd.f32 %v508_v53, %v507_v51  ;;  %v514_v57 = vrot.slane %v513_v54, 1 }
  0x64   : > { %v515_v58 = vadd.f32 %v514_v57, %v513_v54 }
  0x66   : > { %v518_v60 = vcombine.low %v509_v56, %v515_v58 }
  0x68   : > { %v525_v61 = vrot.slane %v518_v60, %v524_v59 }
  0x6a   : > { %v532_v62 = vrot.slane %v525_v61, %v524_v59 }
  0x6c   : > { %538 = vst.msk [vmem:[%s375_s11] sm:$0x3] %vm536_vm4, %v532_v62 }
  0xa2   : > { %v500_v5 = vpop.xlane.xlu1 %499 }
  0xe5   : > { %v479_v0 = vpop.xlane.xlu0 %478 }
  0xe6   : > { %v480_v1 = vadd.f32 %v479_v0, %v471_v63 }
  0xe8   : > { %482 = vst.msk [vmem:[%s1050_s9] sm:$0xf] %vm481_vm5, %v480_v1 }
  0xe9   : > { %v491_v8 = vpop.xlane.xlu0 %490 }
  0xef   : > { %v483_v2 = vld [vmem:[%s1050_s9] sm:$0xf] }
  0xf0   : > { %v492_v4 = vadd.f32 %v491_v8, %v483_v2 }
  0xf2   : > { %494 = vst.msk [vmem:[%s1050_s9] sm:$0xf] %vm493_vm6, %v492_v4 }
  0xf9   : > { %v495_v6 = vld [vmem:[%s1050_s9] sm:$0xf] }
  0xfa   : > { %v501_v7 = vadd.f32 %v500_v5, %v495_v6 }
  0xfc   : > { %503 = vst.msk [vmem:[%s1050_s9] sm:$0xf] %vm502_vm7, %v501_v7 }
 0x11f   : > { %v883_v3 = vpop.f32.mrf.mxu0 }
 0x121   : > { %v884_v9 = vpop.f32.mrf.mxu0 }
 0x122   : > { %v885_v10 = vadd.f32 %v884_v9, %v883_v3 }
 0x124   : > { %650 = vst.msk [vmem:[%s383_s13] sm:$0xf] %vm649_vm8, %v885_v10 }
 0x125 PF: > { %s17_s23 = sadd.s32 1, %s945_s23   ;;  %s1189_s21 = smov %s941_s22 }
 0x126   : > { %p14_p5 = scmp.ge.s32.totalorder %s17_s23, 4   ;;  %s1190_s22 = smov %s1192_s24 }
 0x128   :  { %16 = sbr.rel (!%p14_p5) target bundleno = 2 (0x2), region = 100 }

</bundles_post_ra>
